<compile_context>
chip_gen: v6e
topology: v6e:2x2x1
jax: 0.10.0
libtpu: 0.0.40
codegen_flags: <defaults>
</compile_context>

<pallas_src>
import jax
import jax.numpy as jnp
from jax.experimental import pallas as pl
from jax.experimental.pallas import tpu as pltpu


def _pick_vmem_limit_bytes():
    """Generation-aware scoped-VMEM limit: ~3/4 of physical, capped at 64 MiB."""
    try:
        cap = int(pltpu.get_tpu_info().vmem_capacity_bytes)
        return int(min(64 << 20, (cap * 3) // 4))
    except Exception:
        # Conservative value that is safe on every generation (incl. v7x's 64 MiB).
        return 48 << 20


def _make_maxpool_kernel(hw_total, tile_hw, kps, num_splits, num_hw_tiles):
    """Streaming spatial max-pool kernel with static constants baked in.

    hw_total     : H*W (elements along the spatial axis)
    tile_hw      : lanes per spatial tile
    kps          : HW tiles per split (grid axis 1 extent)
    num_splits   : S-way split of the HW axis (megacore coverage when B is small)
    num_hw_tiles : real (unpadded) number of HW tiles
    """
    ragged = (hw_total % tile_hw) != 0
    mask_start = num_hw_tiles - 1 if ragged else num_hw_tiles   # first global tile needing a mask
    any_masked = mask_start < num_splits * kps                   # includes split padding tiles

    def kernel(x_ref, o_ref, acc_ref):
        # x_ref:   (1, C, TILE_HW) VMEM, native activation dtype
        # o_ref:   (1, C, 1)       VMEM, f32 (per-split partial pooled max)
        # acc_ref: (1, C, 1)       VMEM scratch, running max (native dtype)
        k = pl.program_id(1)
        nk = pl.num_programs(1)
        if num_splits > 1:
            s = pl.program_id(0) % num_splits
            g = s * kps + k            # global HW-tile index
        else:
            g = k

        neg_fill = jnp.finfo(x_ref.dtype).min

        def reduce_and_update(masked):
            xv = x_ref[...]
            if masked:
                # Last real tile (ragged tail) and clamped padding tiles: mask
                # out-of-range lanes to the most-negative finite value.
                col = jax.lax.broadcasted_iota(jnp.int32, xv.shape, 2)
                limit = hw_total - g * tile_hw
                xv = jnp.where(col < limit, xv, jnp.asarray(neg_fill, dtype=xv.dtype))
            tile_max = jnp.max(xv, axis=-1, keepdims=True)       # (1, C, 1) XLU reduce

            @pl.when(k == 0)
            def _init():                                          # init from first tile
                acc_ref[...] = tile_max

            @pl.when(k != 0)
            def _update():                                        # tiny VPU max
                acc_ref[...] = jnp.maximum(acc_ref[...], tile_max)

        if any_masked:
            @pl.when(g < mask_start)
            def _plain():
                reduce_and_update(False)

            @pl.when(g >= mask_start)
            def _tail():
                reduce_and_update(True)
        else:
            reduce_and_update(False)

        @pl.when(k == nk - 1)
        def _finalize():
            o_ref[...] = acc_ref[...].astype(o_ref.dtype)

    return kernel


def channel_attention(x_nchw, w1, w2, *, tile_hw=None, tile_budget_bytes=8 << 20,
                      num_core_splits=None):
    """x_nchw: (B, C, H, W); w1: (C//16, C, 1, 1); w2: (C, C//16, 1, 1).

    Returns sigmoid(fc2(relu(fc1(maxpool(x))))) with shape (B, C, 1, 1), in x's dtype.
    """
    B, C, H, W = x_nchw.shape
    Cr = w1.shape[0]
    HW = H * W
    assert jnp.issubdtype(x_nchw.dtype, jnp.floating), "expects float activations"

    # Stream x in its native dtype (no upcast -> no extra HBM traffic).
    x_flat = x_nchw.reshape(B, C, HW)

    vmem_limit = _pick_vmem_limit_bytes()

    itemsize = jnp.dtype(x_flat.dtype).itemsize
    row_bytes = C * itemsize
    if tile_hw is None:
        # >=512 lanes per tile; target ~tile_budget_bytes; cap so a double-buffered
        # tile (plus headroom) fits the generation's VMEM limit.
        t = max(512, (tile_budget_bytes // row_bytes) // 128 * 128)
        t_cap = ((vmem_limit // 3) // row_bytes) // 128 * 128
        if t_cap >= 128:
            t = min(t, t_cap)
        tile_hw = HW if t >= HW else int(t)   # full extent is always a legal last dim
    num_hw_tiles = int(pl.cdiv(HW, tile_hw))

    # Megacore coverage: with B == 1 only one TensorCore would get work on v7x, so
    # split the HW tiles 2 ways across a leading parallel factor (merged into axis 0).
    if num_core_splits is None:
        num_core_splits = 2 if (B == 1 and num_hw_tiles >= 2) else 1
    S = max(1, min(int(num_core_splits), num_hw_tiles))
    kps = int(pl.cdiv(num_hw_tiles, S))       # HW tiles per split (last split may pad)

    if S > 1:
        def x_index_map(bs, k):
            b = bs // S
            g = (bs % S) * kps + k
            # Clamp padding tiles onto the last real tile; the kernel fully masks them.
            return (b, 0, jnp.minimum(g, num_hw_tiles - 1))

        def o_index_map(bs, k):
            return (bs, 0, 0)
    else:
        x_index_map = lambda b, k: (b, 0, k)
        o_index_map = lambda b, k: (b, 0, 0)

    kernel = _make_maxpool_kernel(HW, tile_hw, kps, S, num_hw_tiles)

    pooled_parts = pl.pallas_call(
        kernel,
        out_shape=jax.ShapeDtypeStruct((B * S, C, 1), jnp.float32),
        grid_spec=pltpu.PrefetchScalarGridSpec(
            num_scalar_prefetch=0,
            grid=(B * S, kps),
            in_specs=[pl.BlockSpec((1, C, tile_hw), x_index_map)],
            out_specs=pl.BlockSpec((1, C, 1), o_index_map),
            scratch_shapes=[pltpu.VMEM((1, C, 1), x_flat.dtype)],
        ),
        compiler_params=pltpu.CompilerParams(
            dimension_semantics=("parallel", "arbitrary"),
            vmem_limit_bytes=int(vmem_limit),
        ),
    )(x_flat)

    # Combine per-split partials and run the tiny 1x1-conv matmuls + activations in
    # XLA, batched over B (hoisted out of the kernel per the performance review).
    pooled = pooled_parts.reshape(B, S, C)
    pooled = jnp.max(pooled, axis=1) if S > 1 else pooled[:, 0, :]
    pooled = pooled.astype(jnp.float32)                               # (B, C)

    w1m = w1.reshape(Cr, C).astype(jnp.float32)
    w2m = w2.reshape(C, Cr).astype(jnp.float32)
    h = jnp.maximum(pooled @ w1m.T, 0.0)                              # (B, Cr) ReLU(fc1)
    out = h @ w2m.T                                                   # (B, C)  fc2
    attn = jax.nn.sigmoid(out).astype(x_nchw.dtype)
    return attn.reshape(B, C, 1, 1)


def channel_attention_ref(x_nchw, w1, w2):
    """Plain-JAX reference mirroring the PyTorch forward exactly."""
    B, C, H, W = x_nchw.shape
    Cr = w1.shape[0]
    pooled = jnp.max(x_nchw.reshape(B, C, H * W).astype(jnp.float32), axis=-1)  # (B, C)
    h = jnp.maximum(pooled @ w1.reshape(Cr, C).T.astype(jnp.float32), 0.0)       # (B, Cr)
    out = h @ w2.reshape(C, Cr).T.astype(jnp.float32)                            # (B, C)
    return jax.nn.sigmoid(out).astype(x_nchw.dtype).reshape(B, C, 1, 1)


if __name__ == "__main__":
    key = jax.random.PRNGKey(0)
    kx, k1, k2, kx2 = jax.random.split(key, 4)

    B, C = 2, 32
    Cr = C // 16
    w1 = 0.1 * jax.random.normal(k1, (Cr, C, 1, 1), dtype=jnp.float32)
    w2 = 0.1 * jax.random.normal(k2, (C, Cr, 1, 1), dtype=jnp.float32)

    # --- Test 1: small shape, single full-extent spatial tile ------------------
    H, W = 16, 16
    x = jax.random.normal(kx, (B, C, H, W), dtype=jnp.float32)
    out = jax.block_until_ready(channel_attention(x, w1, w2))
    ref = jax.block_until_ready(channel_attention_ref(x, w1, w2))
    assert out.shape == (B, C, 1, 1)
    assert jnp.allclose(out, ref, atol=1e-5, rtol=1e-5), "mismatch vs reference (test 1)"

    # --- Test 2: multi-tile streaming with ragged tail + all-negative x --------
    # HW = 17*17 = 289 (not 128-aligned), tile_hw=128 -> 3 tiles, only the last masked.
    H2, W2 = 17, 17
    x2 = -jnp.abs(jax.random.normal(kx2, (B, C, H2, W2), dtype=jnp.float32)) - 1.0
    out2 = jax.block_until_ready(channel_attention(x2, w1, w2, tile_hw=128))
    ref2 = jax.block_until_ready(channel_attention_ref(x2, w1, w2))
    assert jnp.allclose(out2, ref2, atol=1e-5, rtol=1e-5), "mismatch vs reference (test 2)"

    # --- Test 3: B=1 -> 2-way megacore split of the HW axis (padding + clamp) ---
    x3 = jax.random.normal(kx2, (1, C, H2, W2), dtype=jnp.float32)
    out3 = jax.block_until_ready(channel_attention(x3, w1, w2, tile_hw=128))
    ref3 = jax.block_until_ready(channel_attention_ref(x3, w1, w2))
    assert out3.shape == (1, C, 1, 1)
    assert jnp.allclose(out3, ref3, atol=1e-5, rtol=1e-5), "mismatch vs reference (test 3)"

    print("KERNEL_OK")
</pallas_src>

<mosaic_0001>
module attributes {stable_mosaic.version = 11 : i64} {
  func.func @kernel(%arg0: i32, %arg1: i32, %arg2: memref<1x32x256xf32, #tpu.memory_space<vmem>>, %arg3: memref<1x32x1xf32, #tpu.memory_space<vmem>>, %arg4: memref<1x32x1xf32, #tpu.memory_space<vmem>>) attributes {dimension_semantics = [#tpu.dimension_semantics<parallel>, #tpu.dimension_semantics<arbitrary>], iteration_bounds = array<i64: 2, 1>, scalar_prefetch = 0 : i64, scratch_operands = 1 : i64, tpu.core_type = #tpu.core_type<tc>, window_params = [{transform_indices = @transform_0, window_bounds = array<i64: 1, 32, 256>}, {transform_indices = @transform_1, window_bounds = array<i64: 1, 32, 1>}]} {
    %c0 = arith.constant 0 : index
    %c0_0 = arith.constant 0 : index
    %c0_1 = arith.constant 0 : index
    %0 = vector.load %arg2[%c0, %c0_0, %c0_1] : memref<1x32x256xf32, #tpu.memory_space<vmem>>, vector<1x32x256xf32>
    %cst = arith.constant dense<0xFF800000> : vector<1x32xf32>
    %1 = vector.multi_reduction <maximumf>, %0, %cst [2] : vector<1x32x256xf32> to vector<1x32xf32>
    %2 = vector.shape_cast %1 : vector<1x32xf32> to vector<1x32x1xf32>
    %c0_i32 = arith.constant 0 : i32
    %3 = arith.cmpi eq, %arg1, %c0_i32 : i32
    %4 = arith.extui %3 : i1 to i32
    %c0_i32_2 = arith.constant 0 : i32
    %5 = arith.cmpi ne, %4, %c0_i32_2 : i32
    scf.if %5 {
      %c0_7 = arith.constant 0 : index
      %c0_8 = arith.constant 0 : index
      %c0_9 = arith.constant 0 : index
      %12 = vector.load %arg4[%c0_7, %c0_8, %c0_9] : memref<1x32x1xf32, #tpu.memory_space<vmem>>, vector<1x32x1xf32>
      tpu.vector_store %arg4[%c0_7, %c0_8, %c0_9], %2 {strides = array<i32>} : memref<1x32x1xf32, #tpu.memory_space<vmem>>, vector<1x32x1xf32>,
    } else {
    }
    %c0_i32_3 = arith.constant 0 : i32
    %6 = arith.cmpi ne, %arg1, %c0_i32_3 : i32
    %7 = arith.extui %6 : i1 to i32
    %c0_i32_4 = arith.constant 0 : i32
    %8 = arith.cmpi ne, %7, %c0_i32_4 : i32
    scf.if %8 {
      %c0_7 = arith.constant 0 : index
      %c0_8 = arith.constant 0 : index
      %c0_9 = arith.constant 0 : index
      %12 = vector.load %arg4[%c0_7, %c0_8, %c0_9] : memref<1x32x1xf32, #tpu.memory_space<vmem>>, vector<1x32x1xf32>
      %13 = arith.maximumf %12, %2 : vector<1x32x1xf32>
      %c0_10 = arith.constant 0 : index
      %c0_11 = arith.constant 0 : index
      %c0_12 = arith.constant 0 : index
      %14 = vector.load %arg4[%c0_10, %c0_11, %c0_12] : memref<1x32x1xf32, #tpu.memory_space<vmem>>, vector<1x32x1xf32>
      tpu.vector_store %arg4[%c0_10, %c0_11, %c0_12], %13 {strides = array<i32>} : memref<1x32x1xf32, #tpu.memory_space<vmem>>, vector<1x32x1xf32>,
    } else {
    }
    %c0_i32_5 = arith.constant 0 : i32
    %9 = arith.cmpi eq, %arg1, %c0_i32_5 : i32
    %10 = arith.extui %9 : i1 to i32
    %c0_i32_6 = arith.constant 0 : i32
    %11 = arith.cmpi ne, %10, %c0_i32_6 : i32
    scf.if %11 {
      %c0_7 = arith.constant 0 : index
      %c0_8 = arith.constant 0 : index
      %c0_9 = arith.constant 0 : index
      %12 = vector.load %arg4[%c0_7, %c0_8, %c0_9] : memref<1x32x1xf32, #tpu.memory_space<vmem>>, vector<1x32x1xf32>
      %c0_10 = arith.constant 0 : index
      %c0_11 = arith.constant 0 : index
      %c0_12 = arith.constant 0 : index
      %13 = vector.load %arg3[%c0_10, %c0_11, %c0_12] : memref<1x32x1xf32, #tpu.memory_space<vmem>>, vector<1x32x1xf32>
      tpu.vector_store %arg3[%c0_10, %c0_11, %c0_12], %12 {strides = array<i32>} : memref<1x32x1xf32, #tpu.memory_space<vmem>>, vector<1x32x1xf32>,
    } else {
    }
    return
  }
  func.func @transform_0(%arg0: i32, %arg1: i32) -> (i32, i32, i32) {
    %c0_i32 = arith.constant 0 : i32
    %c0_i32_0 = arith.constant 0 : i32
    return %arg0, %c0_i32, %arg1 : i32, i32, i32
  }
  func.func @transform_1(%arg0: i32, %arg1: i32) -> (i32, i32, i32) {
    %c0_i32 = arith.constant 0 : i32
    %c0_i32_0 = arith.constant 0 : i32
    %c0_i32_1 = arith.constant 0 : i32
    return %arg0, %c0_i32, %c0_i32_0 : i32, i32, i32
  }
}

</mosaic_0001>

<bundles_post_ra>
// kernel: tpu_custom_call.1
= control target key start
LH: loop header
LB: loop body
LE: loop exit
PB: predicated region body
PF: predicated region fallthrough
CT: control target
= control target key end

     0   :  { %6 = vsyncpa [#allocation4], 0  ;;  %s559_s0 = inlined_call_operand.hbm [shape: f32[2,32,256], index: 0, kind: input, shape index: {}]   ;;  %s560_s1 = inlined_call_operand.vmem [shape: f32[2,32,1], index: 1, kind: output, shape index: {}]  }
   0x1   :  { %8 = vsyncpa [#allocation4 + $0x1], 0  ;;  %s455_s6 = smov 0   ;;  %s457_s7 = smov 0  }
   0x2   :  { %s459_s8 = smov 0   ;;  %s461_s9 = smov 0  }
   0x3   :  { %s463_s10 = smov 0   ;;  %s465_s11 = smov 0  }
   0x4 LB: > { %s290_s12 = sadd.s32 4294967295, %s440_s11   ;;  %s26_s13 = sadd.s32 1, %s436_s10  ;;  %s440_s11 = sphi %s465_s11, %s14_s11   ;;  %s436_s10 = sphi %s463_s10, %s568_s10   ;;  %s432_s9 = sphi %s461_s9, %s567_s9   ;;  %s428_s8 = sphi %s459_s8, %s566_s8   ;;  %s424_s7 = sphi %s457_s7, %s565_s7   ;;  %s420_s6 = sphi %s455_s6, %s564_s6  }
   0x5   : > { %p28_p0 = scmp.ge.s32.totalorder %s26_s13, 2  ;;  %s35_s14 = sadd.s32 1, %s428_s8 }
   0x6   : > { %p42_p1 = scmp.ne.s32.totalorder %s428_s8, %s424_s7  ;;  %p43_p2 = scmp.eq.s32.totalorder %s440_s11, 0 }
   0x7   : > { %s570_s13 = smov (%p28_p0, %s26_s13), 0  ;;  %p48_p4 = scmp.ne.s32.totalorder %s424_s7, %s420_s6 }
   0x8   : > { %p491_p3 = por %p43_p2, %p42_p1  ;;  %s30_s16 = ssub.s32 %s436_s10, %s570_s13 }
   0x9   : > { %p49_p5 = scmp.eq.s32.totalorder %s290_s12, 0  ;;  %p33_p6 = scmp.eq.s32.totalorder %s30_s16, 0 }
   0xa   : > { %p311_p8 = scmp.lt.s32.totalorder %s440_s11, 2  ;;  %s98_s19 = sand.u32 1, %s428_s8  }
   0xb   : > { %p498_p7 = por %p49_p5, %p48_p4  ;;  %s303_s20 = sshll.u32 %s436_s10, 10 }
   0xc   : > { %s504_s18 = scalar_select %p33_p6, %s428_s8, %s35_s14  }
   0xd   : > { %s294_s21 = sshll.u32 %s98_s19, 6  ;;  %s110_s24 = scalar_lea.hbm %s559_s0, %s303_s20 }
   0xe   : > { %s102_s25 = scalar_lea.vmem [#allocation3], %s294_s21  ;;  %p513_p9 = pnand %p311_p8, %p491_p3 }
   0xf   : > { %s111_s26 = sshll.u32 %s102_s25, 4  ;;  %s99_s28 = scalar_lea.sflag [#allocation4], %s98_s19  ;;  %s112_s26 = int_to_ptr.vmem [resolvable:$true] %s111_s26 }
  0x10   : > { %p364_p10 = pneg %p513_p9  ;;  %s375_s29 = scalar_lea.vmem %s112_s26, 1024 }
  0x11   : > { %p376_p11 = scmp.ne.s32.totalorder %s112_s26, %s375_s29  ;;  %s442_s30 = smov [#allocation3]  }
  0x12   : > { %s380_s2 = sshll.u32 %s442_s30, 4  ;;  %s381_s2 = int_to_ptr.vmem [resolvable:$false] %s380_s2 }
  0x13   : > { %p378_p12 = pnand %p376_p11, %p364_p10  ;;  %s382_s3 = scalar_lea.vmem %s381_s2, 2048 }
  0x14   : > { %p383_p0 = scmp.lt.s32.totalorder %s112_s26, %s381_s2  ;;  %p384_p1 = scmp.lt.s32.totalorder %s382_s3, %s375_s29 }
  0x15   : > { %p379_p13 = pneg %p378_p12 }
  0x16   : > { %p385_p2 = por %p384_p1, %p383_p0 }
  0x18   : > { %p386_p3 = pnand %p385_p2, %p379_p13 }
  0x1a   : > { %389 = shalt.err (!%p386_p3)
}
  0x1b   : > { %s443_s4 = smov 256   ;;  %s444_s5 = smov 16  }
  0x1c   : > { %310 = dma.hbm_to_vmem [thread:$0]  (!%p513_p9), %s110_s24, 1024, %s112_s26, %s99_s28, %s443_s4, %s443_s4, %s444_s5  }
  0x1d   : > { %p297_p4 = scmp.ge.s32.totalorder %s440_s11, 1  ;;  %p119_p5 = scmp.lt.s32.totalorder %s440_s11, 3 }
  0x1f   : > { %p120_p6 = pnand %p297_p4, %p119_p5 }
  0x20   : > { %s125_s6 = sand.u32 (!%p120_p6), 1, %s424_s7  }
  0x21   : > { %123 = sbr.rel (%p120_p6) target bundleno = 194 (0xc2), region = 24  ;;  %s298_s12 = sshll.u32 (!%p120_p6), %s125_s6, 6 }
  0x22   : > { %s126_s14 = scalar_lea.sflag (!%p120_p6), [#allocation4], %s125_s6  ;;  %s129_s15 = scalar_lea.vmem (!%p120_p6), [#allocation3], %s298_s12 }
  0x26   : > { %415 = dma.done.wait (%p498_p7), %s126_s14, 1024  }
  0x27   : > { %417 = vsyncadd (%p498_p7), %s126_s14, 4294966272  ;;  %v158_v0 = vld [vmem:[%s129_s15 + $0x20] sm:$0xff]  ;;  %v159_v1 = vld [vmem:[%s129_s15 + $0x28] sm:$0xff]  ;;  %p149_p8 = scmp.lt.s32.totalorder %s432_s9, 1  ;;  %vm178_vm0 = vcmask 7168  }
  0x28   : > { %v154_v2 = vld [vmem:[%s129_s15] sm:$0xff]  ;;  %v168_v3 = vmax.f32 %v158_v0, %v159_v1  ;;  %v155_v4 = vld [vmem:[%s129_s15 + $0x8] sm:$0xff]  ;;  %v160_v5 = vld [vmem:[%s129_s15 + $0x30] sm:$0xff] }
  0x29   : > { %v161_v6 = vld [vmem:[%s129_s15 + $0x38] sm:$0xff]  ;;  %v162_v7 = vmax.f32 %v154_v2, %v155_v4  ;;  %v156_v8 = vld [vmem:[%s129_s15 + $0x10] sm:$0xff]  ;;  %s572_s9 = smov (!%p149_p8, %s432_s9), 1 }
  0x2a   : > { %v157_v9 = vld [vmem:[%s129_s15 + $0x18] sm:$0xff]  ;;  %169 = vmax.xlane.f32.xlu1 %v168_v3  ;;  %v171_v10 = vmax.f32 %v160_v5, %v161_v6  ;;  %s304_s16 = sshll.u32 %s572_s9, 5 }
  0x2b   : > { %163 = vmax.xlane.f32.xlu0 %v162_v7  ;;  %v165_v11 = vmax.f32 %v156_v8, %v157_v9  ;;  %s153_s20 = scalar_lea.vmem %s560_s1, %s304_s16 }
  0x2e   : > { %172 = vmax.xlane.f32.xlu1 %v171_v10 }
  0x2f   : > { %166 = vmax.xlane.f32.xlu0 %v165_v11 }
  0xb3   : > { %v170_v12 = vpop.xlane.xlu1 %169 }
  0xb4   : > { %181 = vst.msk [vmem:[#allocation2 + $0x10] sm:$0xff] %vm178_vm0, %v170_v12  ;;  %v164_v13 = vpop.xlane.xlu0 %163 }
  0xb5   : > { %179 = vst.msk [vmem:[#allocation2] sm:$0xff] %vm178_vm0, %v164_v13 }
  0xb7   : > { %v173_v14 = vpop.xlane.xlu1 %172 }
  0xb8   : > { %182 = vst.msk [vmem:[#allocation2 + $0x18] sm:$0xff] %vm178_vm0, %v173_v14  ;;  %v167_v15 = vpop.xlane.xlu0 %166 }
  0xb9   : > { %180 = vst.msk [vmem:[#allocation2 + $0x8] sm:$0xff] %vm178_vm0, %v167_v15 }
  0xbb   : > { %v205_v16 = vld [vmem:[#allocation2 + $0x10] sm:$0xff] }
  0xbc   : > { %210 = vst.msk [vmem:[%s153_s20 + $0x10] sm:$0xff] %vm178_vm0, %v205_v16  ;;  %v203_v17 = vld [vmem:[#allocation2] sm:$0xff] }
  0xbd   : > { %208 = vst.msk [vmem:[%s153_s20] sm:$0xff] %vm178_vm0, %v203_v17 }
  0xbf   : > { %v206_v18 = vld [vmem:[#allocation2 + $0x18] sm:$0xff] }
  0xc0   : > { %211 = vst.msk [vmem:[%s153_s20 + $0x18] sm:$0xff] %vm178_vm0, %v206_v18  ;;  %v204_v19 = vld [vmem:[#allocation2 + $0x8] sm:$0xff] }
  0xc1   : > { %209 = vst.msk [vmem:[%s153_s20 + $0x8] sm:$0xff] %vm178_vm0, %v204_v19 }
  0xc2 PF: > { %s14_s11 = sadd.s32 1, %s440_s11   ;;  %s564_s6 = smov %s424_s7 }
  0xc3   : > { %p11_p7 = scmp.ge.s32.totalorder %s14_s11, 4   ;;  %s565_s7 = smov %s428_s8 }
  0xc4   : > { %s566_s8 = smov %s504_s18  ;;  %s567_s9 = smov %s436_s10 }
  0xc5   : > { %s568_s10 = smov %s570_s13  ;;  %13 = sbr.rel (!%p11_p7) target bundleno = 4 (0x4), region = 76 }
  0xca   :  { %233 = vsyncpa [#allocation4], 1 }
  0xcb   :  { %235 = vsyncpa [#allocation4 + $0x1], 1 }

</bundles_post_ra>
